<compile_context>
chip_gen: v6e
topology: v6e:2x2x1
jax: 0.10.0
libtpu: 0.0.40
codegen_flags: <defaults>
</compile_context>

<pallas_src>
import jax
import jax.numpy as jnp
from jax.experimental import pallas as pl
from jax.experimental.pallas import tpu as pltpu


def ffn_kernel(x_ref, w1_ref, b1_ref, w2_ref, b2_ref, gamma_ref, beta_ref,
               o_ref, acc_ref):
    k = pl.program_id(1)

    @pl.when(k == 0)
    def _init():
        # Fold the residual and the second-layer bias into the accumulator so
        # the epilogue only has to do LayerNorm.
        acc_ref[...] = (x_ref[...].astype(jnp.float32)
                        + b2_ref[...].astype(jnp.float32))

    # First matmul in native dtype, f32 accumulation: (tm, d_model) x (d_model, tk)
    h = jnp.dot(x_ref[...], w1_ref[...], preferred_element_type=jnp.float32)
    h = jnp.maximum(h + b1_ref[...].astype(jnp.float32), 0.0)

    # Second matmul: cast the ReLU intermediate to the weight dtype so bf16
    # weights hit the single-pass MXU path; accumulate in f32 scratch across k.
    acc_ref[...] += jnp.dot(h.astype(w2_ref.dtype), w2_ref[...],
                            preferred_element_type=jnp.float32)

    @pl.when(k == pl.num_programs(1) - 1)
    def _epilogue():
        y = acc_ref[...]
        # LayerNorm over d_model (biased variance, eps inside rsqrt), f32 math.
        mean = jnp.mean(y, axis=-1, keepdims=True)
        var = jnp.mean((y - mean) ** 2, axis=-1, keepdims=True)
        y_hat = (y - mean) * jax.lax.rsqrt(var + 1e-6)
        out = (y_hat * gamma_ref[...].astype(jnp.float32)
               + beta_ref[...].astype(jnp.float32))
        o_ref[...] = out.astype(o_ref.dtype)


def _round_up(a, b):
    return (a + b - 1) // b * b


def _vmem_budget():
    """Per-generation usable VMEM (bytes), with ~20% headroom left for the
    compiler's internal scratch / semaphores."""
    try:
        cap = pltpu.get_tpu_info().vmem_capacity_bytes
    except Exception:
        cap = 64 << 20            # conservative fallback: v7x per-TensorCore size
    return int(cap * 0.80)


def _vmem_need_bytes(tm, tk, d_model, x_isize, w_isize):
    """Rough VMEM footprint for one grid step (double-buffered BlockSpecs)."""
    need = 0
    need += 2 * tm * d_model * x_isize      # x tile
    need += 2 * tm * d_model * x_isize      # out tile
    need += 2 * d_model * tk * w_isize      # W1 block
    need += 2 * tk * d_model * w_isize      # W2 block
    need += 2 * tk * w_isize                # b1 block
    need += 6 * d_model * w_isize           # b2 / gamma / beta
    need += tm * d_model * 4                # f32 accumulator scratch
    need += tm * tk * 4                     # f32 ReLU intermediate
    need += tm * tk * w_isize               # cast copy fed to the 2nd matmul
    return need


def _pick_tm(M, desired, sub):
    """Token tile: a multiple of `sub` that divides M when possible (avoids a
    padded HBM copy of x) and leaves >=2 tiles for v7x megacore on big inputs."""
    desired = _round_up(max(sub, min(desired, M)), sub)
    if M % sub == 0:
        t = min(desired, M)
        t -= t % sub
        while t >= sub and M % t != 0:
            t -= sub
        if t >= sub:
            # Avoid a single huge token tile (would idle one v7x TensorCore).
            if M // t == 1 and t >= 256:
                half = t // 2
                if half % sub == 0 and M % half == 0:
                    t = half
            return t, M
    # No exact divisor: pad the token axis (materializes one padded copy of x).
    return desired, _round_up(M, desired)


def _pick_tk(d_ff, tm, d_model, x_isize, w_isize, budget, target):
    """d_ff reduction tile.  Prefer the whole d_ff (resident weights, single
    reduction step); otherwise the largest 128-aligned divisor that fits."""
    if _vmem_need_bytes(tm, d_ff, d_model, x_isize, w_isize) <= budget:
        return d_ff
    best = None
    t = 128
    cap = min(target, d_ff)
    while t <= cap:
        if d_ff % t == 0 and _vmem_need_bytes(tm, t, d_model, x_isize, w_isize) <= budget:
            best = t
        t += 128
    if best is None:
        # No aligned divisor fits the budget: stream the whole d_ff and let
        # the compiler raise a clear error if VMEM is truly exceeded.
        return d_ff
    return best


def positionwise_feed_forward(x, w1, b1, w2, b2, gamma, beta, *,
                              tm=512, tk_target=1024, matmul_dtype=None):
    """x: [B, S, d_model] -> [B, S, d_model].

    matmul_dtype: optional dtype (e.g. jnp.bfloat16) to down-cast x/W1/W2 for
    the fast single-pass MXU path; accumulation stays f32 and the output keeps
    the original dtype of x.
    """
    B, S, d_model = x.shape
    d_ff = w1.shape[1]
    M = B * S
    out_dtype = x.dtype

    if matmul_dtype is not None:
        x = x.astype(matmul_dtype)
        w1 = w1.astype(matmul_dtype)
        w2 = w2.astype(matmul_dtype)

    x_isize = x.dtype.itemsize
    w_isize = w1.dtype.itemsize
    sub = 8 * max(1, 4 // x_isize)          # sublane packing: f32->8, bf16->16
    budget = _vmem_budget()

    # Pick the token tile; shrink it if even the smallest d_ff block overflows VMEM.
    desired_tm = tm
    min_tk = d_ff if d_ff < 128 else 128
    while True:
        tm_eff, M_pad = _pick_tm(M, desired_tm, sub)
        if (tm_eff <= sub
                or _vmem_need_bytes(tm_eff, min_tk, d_model, x_isize, w_isize) <= budget):
            break
        desired_tm = max(sub, tm_eff // 2)

    tk_eff = _pick_tk(d_ff, tm_eff, d_model, x_isize, w_isize, budget, tk_target)

    x2d = x.reshape(M, d_model)
    if M_pad > M:
        # Padded rows produce finite, row-local garbage and are discarded below.
        x2d = jnp.pad(x2d, ((0, M_pad - M), (0, 0)))

    # Biases / LN params kept 2D (1, feat) so they broadcast cleanly in-kernel.
    b1_2d = b1.reshape(1, d_ff)
    b2_2d = b2.reshape(1, d_model)
    gamma_2d = gamma.reshape(1, d_model)
    beta_2d = beta.reshape(1, d_model)

    grid = (M_pad // tm_eff, d_ff // tk_eff)

    need = _vmem_need_bytes(tm_eff, tk_eff, d_model, x_isize, w_isize)
    vmem_limit = min(budget, max(int(1.5 * need) + (2 << 20), 32 << 20))

    out2d = pl.pallas_call(
        ffn_kernel,
        out_shape=jax.ShapeDtypeStruct((M_pad, d_model), out_dtype),
        grid_spec=pltpu.PrefetchScalarGridSpec(
            num_scalar_prefetch=0,
            grid=grid,
            in_specs=[
                pl.BlockSpec((tm_eff, d_model), lambda i, k: (i, 0)),   # x tile
                pl.BlockSpec((d_model, tk_eff), lambda i, k: (0, k)),   # W1 cols
                pl.BlockSpec((1, tk_eff), lambda i, k: (0, k)),         # b1 slice
                pl.BlockSpec((tk_eff, d_model), lambda i, k: (k, 0)),   # W2 rows
                pl.BlockSpec((1, d_model), lambda i, k: (0, 0)),        # b2
                pl.BlockSpec((1, d_model), lambda i, k: (0, 0)),        # gamma
                pl.BlockSpec((1, d_model), lambda i, k: (0, 0)),        # beta
            ],
            out_specs=pl.BlockSpec((tm_eff, d_model), lambda i, k: (i, 0)),
            scratch_shapes=[pltpu.VMEM((tm_eff, d_model), jnp.float32)],
        ),
        compiler_params=pltpu.CompilerParams(
            dimension_semantics=("parallel", "arbitrary"),
            vmem_limit_bytes=vmem_limit,
        ),
    )(x2d, w1, b1_2d, w2, b2_2d, gamma_2d, beta_2d)

    return out2d[:M].reshape(B, S, d_model)


def reference_ffn(x, w1, b1, w2, b2, gamma, beta):
    hp = jax.lax.Precision.HIGHEST
    h = jnp.maximum(jnp.dot(x, w1, precision=hp) + b1, 0.0)
    y = jnp.dot(h, w2, precision=hp) + b2 + x
    mean = jnp.mean(y, axis=-1, keepdims=True)
    var = jnp.mean((y - mean) ** 2, axis=-1, keepdims=True)
    return (y - mean) / jnp.sqrt(var + 1e-6) * gamma + beta


if __name__ == "__main__":
    B, S, d_model, d_ff = 2, 8, 32, 64
    key = jax.random.PRNGKey(0)
    kx, kw1, kb1, kw2, kb2 = jax.random.split(key, 5)

    x = jax.random.normal(kx, (B, S, d_model), dtype=jnp.float32)
    # nn.Linear(d_model, d_ff): weight [d_ff, d_model]; stored transposed [d_model, d_ff]
    w1 = jax.random.normal(kw1, (d_model, d_ff), dtype=jnp.float32) * 0.1
    b1 = jax.random.normal(kb1, (d_ff,), dtype=jnp.float32) * 0.1
    w2 = jax.random.normal(kw2, (d_ff, d_model), dtype=jnp.float32) * 0.1
    b2 = jax.random.normal(kb2, (d_model,), dtype=jnp.float32) * 0.1
    # nn.LayerNorm default init
    gamma = jnp.ones((d_model,), dtype=jnp.float32)
    beta = jnp.zeros((d_model,), dtype=jnp.float32)

    out = positionwise_feed_forward(x, w1, b1, w2, b2, gamma, beta)
    out = jax.block_until_ready(out)

    ref = reference_ffn(x, w1, b1, w2, b2, gamma, beta)
    assert out.shape == (B, S, d_model)
    err = jnp.max(jnp.abs(out - ref))
    # MXU f32 matmuls may run at reduced precision vs the HIGHEST-precision reference.
    assert jnp.allclose(out, ref, atol=5e-3, rtol=5e-3), f"max err {err}"

    print("KERNEL_OK")
</pallas_src>

<mosaic_0001>
module attributes {stable_mosaic.version = 11 : i64} {
  func.func @ffn_kernel(%arg0: i32, %arg1: i32, %arg2: memref<16x32xf32, #tpu.memory_space<vmem>>, %arg3: memref<32x64xf32, #tpu.memory_space<vmem>>, %arg4: memref<1x64xf32, #tpu.memory_space<vmem>>, %arg5: memref<64x32xf32, #tpu.memory_space<vmem>>, %arg6: memref<1x32xf32, #tpu.memory_space<vmem>>, %arg7: memref<1x32xf32, #tpu.memory_space<vmem>>, %arg8: memref<1x32xf32, #tpu.memory_space<vmem>>, %arg9: memref<16x32xf32, #tpu.memory_space<vmem>>, %arg10: memref<16x32xf32, #tpu.memory_space<vmem>>) attributes {dimension_semantics = [#tpu.dimension_semantics<parallel>, #tpu.dimension_semantics<arbitrary>], iteration_bounds = array<i64: 1, 1>, scalar_prefetch = 0 : i64, scratch_operands = 1 : i64, tpu.core_type = #tpu.core_type<tc>, window_params = [{transform_indices = @transform_0, window_bounds = array<i64: 16, 32>}, {transform_indices = @transform_1, window_bounds = array<i64: 32, 64>}, {transform_indices = @transform_2, window_bounds = array<i64: 1, 64>}, {transform_indices = @transform_3, window_bounds = array<i64: 64, 32>}, {pipeline_mode = #tpu.pipeline_mode<synchronous>, transform_indices = @transform_4, window_bounds = array<i64: 1, 32>}, {pipeline_mode = #tpu.pipeline_mode<synchronous>, transform_indices = @transform_5, window_bounds = array<i64: 1, 32>}, {pipeline_mode = #tpu.pipeline_mode<synchronous>, transform_indices = @transform_6, window_bounds = array<i64: 1, 32>}, {transform_indices = @transform_7, window_bounds = array<i64: 16, 32>}]} {
    %c0_i32 = arith.constant 0 : i32
    %0 = arith.cmpi eq, %arg1, %c0_i32 : i32
    %1 = arith.extui %0 : i1 to i32
    %c0_i32_0 = arith.constant 0 : i32
    %2 = arith.cmpi ne, %1, %c0_i32_0 : i32
    scf.if %2 {
      %c0_16 = arith.constant 0 : index
      %c0_17 = arith.constant 0 : index
      %19 = vector.load %arg2[%c0_16, %c0_17] : memref<16x32xf32, #tpu.memory_space<vmem>>, vector<16x32xf32>
      %c0_18 = arith.constant 0 : index
      %c0_19 = arith.constant 0 : index
      %20 = vector.load %arg6[%c0_18, %c0_19] : memref<1x32xf32, #tpu.memory_space<vmem>>, vector<1x32xf32>
      %21 = vector.broadcast %20 : vector<1x32xf32> to vector<16x32xf32>
      %22 = arith.addf %19, %21 : vector<16x32xf32>
      %c0_20 = arith.constant 0 : index
      %c0_21 = arith.constant 0 : index
      %23 = vector.load %arg10[%c0_20, %c0_21] : memref<16x32xf32, #tpu.memory_space<vmem>>, vector<16x32xf32>
      tpu.vector_store %arg10[%c0_20, %c0_21], %22 {strides = array<i32>} : memref<16x32xf32, #tpu.memory_space<vmem>>, vector<16x32xf32>,
    } else {
    }
    %c0 = arith.constant 0 : index
    %c0_1 = arith.constant 0 : index
    %3 = vector.load %arg2[%c0, %c0_1] : memref<16x32xf32, #tpu.memory_space<vmem>>, vector<16x32xf32>
    %c0_2 = arith.constant 0 : index
    %c0_3 = arith.constant 0 : index
    %4 = vector.load %arg3[%c0_2, %c0_3] : memref<32x64xf32, #tpu.memory_space<vmem>>, vector<32x64xf32>
    %cst = arith.constant dense<0.000000e+00> : vector<16x64xf32>
    %5 = tpu.matmul %3, %4, %cst {dimension_numbers = #tpu.dot_dimension_numbers<[1], [0], [0], [1], [0, 0, 1, 1], [], []>} : vector<16x32xf32>, vector<32x64xf32>, vector<16x64xf32> -> vector<16x64xf32>
    %c0_4 = arith.constant 0 : index
    %c0_5 = arith.constant 0 : index
    %6 = vector.load %arg4[%c0_4, %c0_5] : memref<1x64xf32, #tpu.memory_space<vmem>>, vector<1x64xf32>
    %7 = vector.broadcast %6 : vector<1x64xf32> to vector<16x64xf32>
    %8 = arith.addf %5, %7 : vector<16x64xf32>
    %cst_6 = arith.constant 0.000000e+00 : f32
    %9 = vector.broadcast %cst_6 : f32 to vector<16x64xf32>
    %10 = arith.maximumf %8, %9 : vector<16x64xf32>
    %c0_7 = arith.constant 0 : index
    %c0_8 = arith.constant 0 : index
    %11 = vector.load %arg10[%c0_7, %c0_8] : memref<16x32xf32, #tpu.memory_space<vmem>>, vector<16x32xf32>
    %c0_9 = arith.constant 0 : index
    %c0_10 = arith.constant 0 : index
    %12 = vector.load %arg5[%c0_9, %c0_10] : memref<64x32xf32, #tpu.memory_space<vmem>>, vector<64x32xf32>
    %cst_11 = arith.constant dense<0.000000e+00> : vector<16x32xf32>
    %13 = tpu.matmul %10, %12, %cst_11 {dimension_numbers = #tpu.dot_dimension_numbers<[1], [0], [0], [1], [0, 0, 1, 1], [], []>} : vector<16x64xf32>, vector<64x32xf32>, vector<16x32xf32> -> vector<16x32xf32>
    %14 = arith.addf %11, %13 : vector<16x32xf32>
    %c0_12 = arith.constant 0 : index
    %c0_13 = arith.constant 0 : index
    %15 = vector.load %arg10[%c0_12, %c0_13] : memref<16x32xf32, #tpu.memory_space<vmem>>, vector<16x32xf32>
    tpu.vector_store %arg10[%c0_12, %c0_13], %14 {strides = array<i32>} : memref<16x32xf32, #tpu.memory_space<vmem>>, vector<16x32xf32>,
    %c0_i32_14 = arith.constant 0 : i32
    %16 = arith.cmpi eq, %arg1, %c0_i32_14 : i32
    %17 = arith.extui %16 : i1 to i32
    %c0_i32_15 = arith.constant 0 : i32
    %18 = arith.cmpi ne, %17, %c0_i32_15 : i32
    scf.if %18 {
      %c0_16 = arith.constant 0 : index
      %c0_17 = arith.constant 0 : index
      %19 = vector.load %arg10[%c0_16, %c0_17] : memref<16x32xf32, #tpu.memory_space<vmem>>, vector<16x32xf32>
      %cst_18 = arith.constant dense<0.000000e+00> : vector<16xf32>
      %20 = vector.multi_reduction <add>, %19, %cst_18 [1] : vector<16x32xf32> to vector<16xf32>
      %21 = vector.shape_cast %20 : vector<16xf32> to vector<16x1xf32>
      %cst_19 = arith.constant 3.200000e+01 : f32
      %22 = vector.broadcast %cst_19 : f32 to vector<16x1xf32>
      %23 = arith.divf %21, %22 : vector<16x1xf32>
      %24 = vector.broadcast %23 : vector<16x1xf32> to vector<16x32xf32>
      %25 = arith.subf %19, %24 : vector<16x32xf32>
      %26 = arith.mulf %25, %25 : vector<16x32xf32>
      %cst_20 = arith.constant dense<0.000000e+00> : vector<16xf32>
      %27 = vector.multi_reduction <add>, %26, %cst_20 [1] : vector<16x32xf32> to vector<16xf32>
      %28 = vector.shape_cast %27 : vector<16xf32> to vector<16x1xf32>
      %cst_21 = arith.constant 3.200000e+01 : f32
      %29 = vector.broadcast %cst_21 : f32 to vector<16x1xf32>
      %30 = arith.divf %28, %29 : vector<16x1xf32>
      %31 = vector.broadcast %23 : vector<16x1xf32> to vector<16x32xf32>
      %32 = arith.subf %19, %31 : vector<16x32xf32>
      %cst_22 = arith.constant 9.99999997E-7 : f32
      %33 = vector.broadcast %cst_22 : f32 to vector<16x1xf32>
      %34 = arith.addf %30, %33 : vector<16x1xf32>
      %35 = math.rsqrt %34 : vector<16x1xf32>
      %36 = vector.broadcast %35 : vector<16x1xf32> to vector<16x32xf32>
      %37 = arith.mulf %32, %36 : vector<16x32xf32>
      %c0_23 = arith.constant 0 : index
      %c0_24 = arith.constant 0 : index
      %38 = vector.load %arg7[%c0_23, %c0_24] : memref<1x32xf32, #tpu.memory_space<vmem>>, vector<1x32xf32>
      %39 = vector.broadcast %38 : vector<1x32xf32> to vector<16x32xf32>
      %40 = arith.mulf %37, %39 : vector<16x32xf32>
      %c0_25 = arith.constant 0 : index
      %c0_26 = arith.constant 0 : index
      %41 = vector.load %arg8[%c0_25, %c0_26] : memref<1x32xf32, #tpu.memory_space<vmem>>, vector<1x32xf32>
      %42 = vector.broadcast %41 : vector<1x32xf32> to vector<16x32xf32>
      %43 = arith.addf %40, %42 : vector<16x32xf32>
      %c0_27 = arith.constant 0 : index
      %c0_28 = arith.constant 0 : index
      %44 = vector.load %arg9[%c0_27, %c0_28] : memref<16x32xf32, #tpu.memory_space<vmem>>, vector<16x32xf32>
      tpu.vector_store %arg9[%c0_27, %c0_28], %43 {strides = array<i32>} : memref<16x32xf32, #tpu.memory_space<vmem>>, vector<16x32xf32>,
    } else {
    }
    return
  }
  func.func @transform_0(%arg0: i32, %arg1: i32) -> (i32, i32) {
    %c0_i32 = arith.constant 0 : i32
    %c0_i32_0 = arith.constant 0 : i32
    return %arg0, %c0_i32 : i32, i32
  }
  func.func @transform_1(%arg0: i32, %arg1: i32) -> (i32, i32) {
    %c0_i32 = arith.constant 0 : i32
    %c0_i32_0 = arith.constant 0 : i32
    return %c0_i32, %arg1 : i32, i32
  }
  func.func @transform_2(%arg0: i32, %arg1: i32) -> (i32, i32) {
    %c0_i32 = arith.constant 0 : i32
    %c0_i32_0 = arith.constant 0 : i32
    return %c0_i32, %arg1 : i32, i32
  }
  func.func @transform_3(%arg0: i32, %arg1: i32) -> (i32, i32) {
    %c0_i32 = arith.constant 0 : i32
    %c0_i32_0 = arith.constant 0 : i32
    return %arg1, %c0_i32 : i32, i32
  }
  func.func @transform_4(%arg0: i32, %arg1: i32) -> (i32, i32) {
    %c0_i32 = arith.constant 0 : i32
    %c0_i32_0 = arith.constant 0 : i32
    %c0_i32_1 = arith.constant 0 : i32
    return %c0_i32, %c0_i32_0 : i32, i32
  }
  func.func @transform_5(%arg0: i32, %arg1: i32) -> (i32, i32) {
    %c0_i32 = arith.constant 0 : i32
    %c0_i32_0 = arith.constant 0 : i32
    %c0_i32_1 = arith.constant 0 : i32
    return %c0_i32, %c0_i32_0 : i32, i32
  }
  func.func @transform_6(%arg0: i32, %arg1: i32) -> (i32, i32) {
    %c0_i32 = arith.constant 0 : i32
    %c0_i32_0 = arith.constant 0 : i32
    %c0_i32_1 = arith.constant 0 : i32
    return %c0_i32, %c0_i32_0 : i32, i32
  }
  func.func @transform_7(%arg0: i32, %arg1: i32) -> (i32, i32) {
    %c0_i32 = arith.constant 0 : i32
    %c0_i32_0 = arith.constant 0 : i32
    return %arg0, %c0_i32 : i32, i32
  }
}

</mosaic_0001>

<bundles_post_ra>
// kernel: tpu_custom_call.1
= control target key start
LH: loop header
LB: loop body
LE: loop exit
PB: predicated region body
PF: predicated region fallthrough
CT: control target
= control target key end

     0   :  { %vm42_vm0 = vcmask 261120   ;;  %s501_s0 = inlined_call_operand.vmem [shape: f32[16,32], index: 0, kind: input, shape index: {}]   ;;  %s502_s1 = inlined_call_operand.vmem [shape: f32[32,64], index: 1, kind: input, shape index: {}]   ;;  %s503_s2 = inlined_call_operand.vmem [shape: f32[1,64], index: 2, kind: input, shape index: {}]   ;;  %s504_s3 = inlined_call_operand.vmem [shape: f32[64,32], index: 3, kind: input, shape index: {}]   ;;  %s505_s4 = inlined_call_operand.vmem [shape: f32[1,32], index: 4, kind: input, shape index: {}]   ;;  %s506_s5 = inlined_call_operand.vmem [shape: f32[1,32], index: 5, kind: input, shape index: {}]   ;;  %s507_s6 = inlined_call_operand.vmem [shape: f32[1,32], index: 6, kind: input, shape index: {}]   ;;  %s508_s7 = inlined_call_operand.hbm [shape: f32[16,32], index: 7, kind: output, shape index: {}]  }
   0x1   :  { %v50_v0 = vld [vmem:[%s502_s1 + $0x18] sm:$0xff]  ;;  %v49_v1 = vld [vmem:[%s502_s1 + $0x10] sm:$0xff]  ;;  %v45_v2 = vld [vmem:[%s501_s0] sm:$0xff] }
   0x2   :  { %330 = vmatprep.subr.mxu0 %v50_v0  ;;  %v48_v3 = vld [vmem:[%s502_s1 + $0x8] sm:$0xff]  ;;  %338 = vmatprep.mubr.msk.f32.mxu0 %vm42_vm0, %v45_v2  ;;  %v151_v4 = vld [vmem:[%s504_s3 + $0x38] sm:$0xff]  ;;  %v150_v5 = vld [vmem:[%s504_s3 + $0x30] sm:$0xff] }
   0x3   :  { %331 = vmatpush3.msra.mxu0 %v50_v0  ;;  %341 = vmatprep.subr.mxu1 %v151_v4 }
   0x4   :  { %332 = vmatprep.subr.mxu0 %v49_v1 }
   0x5   :  { %12 = vsyncpa [#allocation4], 0  ;;  %333 = vmatpush3.msra.mxu0 %v49_v1  ;;  %v47_v6 = vld [vmem:[%s502_s1] sm:$0xff]  ;;  %342 = vmatpush3.msra.mxu1 %v151_v4  ;;  %v149_v7 = vld [vmem:[%s504_s3 + $0x28] sm:$0xff]  ;;  %vm152_vm1 = vcmask 523264   ;;  %s389_s9 = smov [#allocation3]  }
   0x6   :  { %334 = vmatprep.subr.mxu0 %v48_v3  ;;  %343 = vmatprep.subr.mxu1 %v150_v5  ;;  %v46_v8 = vld [vmem:[%s501_s0 + $0x8] sm:$0xff]  ;;  %v148_v9 = vld [vmem:[%s504_s3 + $0x20] sm:$0xff]  ;;  %v147_v10 = vld [vmem:[%s504_s3 + $0x18] sm:$0xff]  ;;  %s295_s10 = sshll.u32 %s389_s9, 4  ;;  %s296_s10 = int_to_ptr.vmem [resolvable:$true] %s295_s10 }
   0x7   :  { %335 = vmatpush3.msra.mxu0 %v48_v3  ;;  %344 = vmatpush3.msra.mxu1 %v150_v5  ;;  %v146_v11 = vld [vmem:[%s504_s3 + $0x10] sm:$0xff]  ;;  %v145_v12 = vld [vmem:[%s504_s3 + $0x8] sm:$0xff]  ;;  %v144_v13 = vld [vmem:[%s504_s3] sm:$0xff]  ;;  %s367_s11 = scalar_lea.vmem %s296_s10, 256  ;;  %p372_p1 = scmp.lt.s32.totalorder %s296_s10, %s296_s10 }
   0x8   :  { %336 = vmatprep.subr.mxu0 %v47_v6  ;;  %345 = vmatprep.subr.mxu1 %v149_v7  ;;  %v306_v14 = vld [vmem:[%s505_s4] ss:$0 sm:$0xff]  ;;  %p368_p0 = scmp.ne.s32.totalorder %s296_s10, %s367_s11  ;;  %p373_p2 = scmp.lt.s32.totalorder %s367_s11, %s367_s11 }
   0x9   :  { %337 = vmatpush3.msra.mxu0 %v47_v6  ;;  %346 = vmatpush3.msra.mxu1 %v149_v7  ;;  %v41_v15 = vadd.f32 %v306_v14, %v46_v8  ;;  %v307_v16 = vld [vmem:[%s503_s2] ss:$0 sm:$0xff]  ;;  %v40_v23 = vadd.f32 %v306_v14, %v45_v2 }
   0xa   :  { %339 = vmatmul.mubr.msk.f32.vlgmr.msra.gmra.mxu0 %vm42_vm0, %v46_v8  ;;  %347 = vmatprep.subr.mxu1 %v148_v9  ;;  %v312_v51 = vld [vmem:[%s506_s5] ss:$0 sm:$0xff]  ;;  %p374_p3 = por %p373_p2, %p372_p1 }
   0xb   :  { %348 = vmatpush3.msra.mxu1 %v148_v9  ;;  %44 = vst.msk [vmem:[#allocation2 + $0x8] sm:$0xff] %vm42_vm0, %v41_v15  ;;  %43 = vst.msk [vmem:[#allocation2] sm:$0xff] %vm42_vm0, %v40_v23  ;;  %v313_v53 = vld [vmem:[%s507_s6] ss:$0 sm:$0xff] }
   0xc   :  { %349 = vmatprep.subr.mxu1 %v147_v10  ;;  %p375_p4 = pnand %p374_p3, %p368_p0 }
   0xd   :  { %350 = vmatpush3.msra.mxu1 %v147_v10 }
   0xe   :  { %351 = vmatprep.subr.mxu1 %v146_v11 }
   0xf   :  { %352 = vmatpush3.msra.mxu1 %v146_v11 }
  0x10   :  { %353 = vmatprep.subr.mxu1 %v145_v12 }
  0x11   :  { %354 = vmatpush3.msra.mxu1 %v145_v12 }
  0x12   :  { %355 = vmatprep.subr.mxu1 %v144_v13  ;;  %v143_v24 = vld [vmem:[#allocation2 + $0x8] sm:$0xff]  ;;  %v142_v26 = vld [vmem:[#allocation2] sm:$0xff] }
  0x13   :  { %356 = vmatpush3.msra.mxu1 %v144_v13 }
  0xca   :  { %v340_v17 = vpop.f32.mrf.mxu0 }
  0xcb   :  { %v137_v18 = vadd.f32 %v340_v17, %v307_v16 }
  0xcc   :  { %v131_v19 = vpop.f32.mrf.mxu0 }
  0xcd   :  { %v132_v20 = vadd.f32 %v307_v16, %v131_v19  ;;  %v141_v22 = vmax.f32 %v137_v18, 0.0 }
  0xcf   :  { %v140_v21 = vmax.f32 %v132_v20, 0.0 }
  0xd1   :  { %357 = vmatprep.mubr.msk.f32.mxu1 %vm152_vm1, %v140_v21 }
  0xd2   :  { %358 = vmatmul.mubr.msk.f32.vlgmr.msra.gmra.mxu1 %vm152_vm1, %v141_v22 }
 0x192   :  { %v359_v25 = vpop.f32.mrf.mxu1 }
 0x193   :  { %v235_v27 = vadd.f32 %v359_v25, %v143_v24 }
 0x194   :  { %v225_v28 = vpop.f32.mrf.mxu1 }
 0x195   :  { %237 = vst.msk [vmem:[#allocation2 + $0x8] sm:$0xff] %vm42_vm0, %v235_v27  ;;  %v234_v29 = vadd.f32 %v225_v28, %v142_v26 }
 0x197   :  { %236 = vst.msk [vmem:[#allocation2] sm:$0xff] %vm42_vm0, %v234_v29 }
 0x19c   :  { %v242_v32 = vld [vmem:[#allocation2 + $0x8] sm:$0xff] }
 0x19d   :  { %v246_v33 = vsel %vm42_vm0, %v242_v32, 0.0 }
 0x19e   :  { %v241_v30 = vld [vmem:[#allocation2] sm:$0xff] }
 0x19f   :  { %v243_v31 = vsel %vm42_vm0, %v241_v30, 0.0 }
 0x1a0   :  { %244 = vadd.xlane.f32.xlu0 %v243_v31 }
 0x1a4   :  { %247 = vadd.xlane.f32.xlu0 %v246_v33 }
 0x229   :  { %v245_v34 = vpop.xlane.xlu0 %244 }
 0x22a   :  { %v250_v35 = vmul.f32 0.03125, %v245_v34 }
 0x22c   :  { %v252_v36 = vsub.f32 %v241_v30, %v250_v35 }
 0x22d   :  { %v248_v37 = vpop.xlane.xlu0 %247 }
 0x22e   :  { %v251_v38 = vmul.f32 0.03125, %v248_v37  ;;  %v254_v39 = vmul.f32 %v252_v36, %v252_v36 }
 0x230   :  { %v253_v40 = vsub.f32 %v242_v32, %v251_v38  ;;  %v256_v41 = vsel %vm42_vm0, %v254_v39, 0.0 }
 0x231   :  { %257 = vadd.xlane.f32.xlu1 %v256_v41 }
 0x232   :  { %v255_v42 = vmul.f32 %v253_v40, %v253_v40 }
 0x234   :  { %v259_v43 = vsel %vm42_vm0, %v255_v42, 0.0 }
 0x235   :  { %260 = vadd.xlane.f32.xlu1 %v259_v43 }
 0x2ba   :  { %v258_v44 = vpop.xlane.xlu1 %257 }
 0x2bb   :  { %v262_v45 = vmul.f32 0.03125, %v258_v44 }
 0x2bd   :  { %v264_v46 = vadd.f32 1e-06, %v262_v45 }
 0x2be   :  { %v261_v47 = vpop.xlane.xlu1 %260 }
 0x2bf   :  { %363 = vrsqrt.f32 %v264_v46  ;;  %v263_v48 = vmul.f32 0.03125, %v261_v47 }
 0x2c1   :  { %v265_v49 = vadd.f32 1e-06, %v263_v48 }
 0x2c3   :  { %365 = vrsqrt.f32 %v265_v49 }
 0x2cc   :  { %v364_v50 = vpop.eup %363 }
 0x2cd   :  { %v268_v52 = vmul.f32 %v364_v50, %v252_v36 }
 0x2cf   :  { %v277_v54 = vmul.f32 %v312_v51, %v268_v52 }
 0x2d0   :  { %v366_v55 = vpop.eup %365 }
 0x2d1   :  { %v269_v56 = vmul.f32 %v366_v55, %v253_v40  ;;  %v286_v57 = vadd.f32 %v313_v53, %v277_v54 }
 0x2d3   :  { %v278_v58 = vmul.f32 %v312_v51, %v269_v56  ;;  %288 = vst.msk [vmem:[#allocation3] sm:$0xff] %vm42_vm0, %v286_v57 }
 0x2d5   :  { %v287_v59 = vadd.f32 %v313_v53, %v278_v58 }
 0x2d7   :  { %289 = vst.msk [vmem:[#allocation3 + $0x8] sm:$0xff] %vm42_vm0, %v287_v59 }
 0x2d8   :  { %378 = shalt.err (!%p375_p4)
}
 0x2d9   :  { %s390_s5 = smov 128   ;;  %s391_s6 = smov 8  }
 0x2da   :  { %301 = dma.vmem_to_hbm [thread:$0]  %s296_s10, 256, %s508_s7, [#allocation4], %s390_s5, %s390_s5, %s391_s6  }
 0x2db   :  { %387 = dma.done.wait [#allocation4], 256  }
 0x2dc   :  { %388 = vsyncadd [#allocation4], 4294967040 }
 0x2dd   :  { %305 = vsyncpa [#allocation4], 1 }

</bundles_post_ra>
